<compile_context>
chip_gen: v7x
topology: tpu7x:2x2x1
jax: 0.10.0
libtpu: 0.0.40
codegen_flags: <defaults>
</compile_context>

<pallas_src>
import functools

import jax
import jax.numpy as jnp
from jax import lax
from jax.experimental import pallas as pl
from jax.experimental.pallas import tpu as pltpu

LANES = 128
SUBLANES = 8


def _round_up(x, m):
    return ((x + m - 1) // m) * m


def _chip_config():
    """(tensorcores_per_chip, row_cap, vmem_budget_for_input_streams)."""
    kind = ""
    try:
        kind = (getattr(jax.devices()[0], "device_kind", "") or "").lower()
    except Exception:
        pass
    if "v7" in kind:
        # 2 TCs, 64 MiB physical VMEM / 32 MiB scoped default, ~3.2 TB/s HBM.
        return 2, 8192, 26 << 20
    if "v6" in kind:
        # 1 TC, 128 MiB physical VMEM / 32 MiB scoped default.
        return 1, 8192, 26 << 20
    # v5e / unknown -> conservative (16 MiB scoped default on v5e).
    return 1, 4096, 12 << 20


def _loss_kernel(w_ref, pred_ref, target_ref, grad_ref, out_ref, acc_ref, *,
                 steps, tile_rows, nblk, tail_rows, mask_last_block,
                 gate_blocks):
    """Per (partial p, reduction i) step: accumulate sum((t + w*p*|g|)^2)."""
    i = pl.program_id(1)

    @pl.when(i == 0)
    def _init():
        acc_ref[...] = jnp.zeros_like(acc_ref)

    w = w_ref[0, 0]
    pred = pred_ref[...].astype(jnp.float32)
    targ = target_ref[...].astype(jnp.float32)
    grd = grad_ref[...].astype(jnp.float32)

    t = targ + w * pred * jnp.abs(grd)
    sq = t * t

    def accum(vals):
        # vreg-shaped accumulator: elementwise VPU adds over the leading axis,
        # no per-step cross-lane reduction.
        acc_ref[...] += jnp.sum(
            vals.reshape(tile_rows // SUBLANES, SUBLANES, LANES), axis=0)

    b = pl.program_id(0) * steps + i  # logical row-block index

    if mask_last_block:
        # Full (unmasked) blocks: cheap scalar gate, no elementwise mask work.
        @pl.when(b < nblk - 1)
        def _full():
            accum(sq)

        # Single partial edge block: mask out Pallas garbage rows only.
        # (Lane-remainder zero padding contributes exactly 0 to the sum, so no
        # lane-level mask is needed; row threshold is a static Python int.)
        @pl.when(b == nblk - 1)
        def _tail():
            r = lax.broadcasted_iota(jnp.int32, (tile_rows, LANES), 0)
            accum(jnp.where(r < tail_rows, sq, 0.0))
    elif gate_blocks:
        # Skip fully-clamped duplicate blocks (b >= nblk) with a scalar gate.
        @pl.when(b < nblk)
        def _real():
            accum(sq)
    else:
        accum(sq)

    @pl.when(i == steps - 1)
    def _fin():
        # Single XLU reduce to a scalar partial sum, once per partial index.
        out_ref[...] = jnp.sum(acc_ref[...]).reshape(1, 1)


def custom_loss(pred, target, grad, weight=1.0):
    """Pallas TPU implementation of CustomLoss.forward.

    pred, target, grad: arrays of identical shape (any rank, any float dtype;
                        math is done in f32 after an in-kernel upcast).
    weight: python / jnp scalar.
    Returns a float32 scalar (0-d array).
    """
    assert pred.shape == target.shape == grad.shape
    total = pred.size

    num_cores, row_cap, vmem_budget = _chip_config()

    in_itembytes = sum(jnp.dtype(x.dtype).itemsize for x in (pred, target, grad))
    # Double-buffered input streams per row of 128 lanes.
    bytes_per_row = 2 * LANES * in_itembytes
    rows_budget = max(SUBLANES, vmem_budget // bytes_per_row)
    tile_cap = max(SUBLANES, min(row_cap, (rows_budget // SUBLANES) * SUBLANES))

    rows = pl.cdiv(total, LANES)  # lane-aligned row count

    if rows <= tile_cap:
        # Small path: one block covering the whole (zero-padded) array.  The
        # pad is cheap here and zero padding contributes exactly 0 to the sum.
        rows_p = _round_up(rows, SUBLANES)
        tile_rows = rows_p
    else:
        # Streaming path: only lane-align; a ragged last row-block is handled
        # by Pallas edge-block loading + the in-kernel row mask.
        # TODO(synk): for total % 128 != 0 the jnp.pad below still copies the
        # whole array; the <128-element remainder could be folded in outside
        # the kernel to avoid that copy.
        rows_p = rows
        tile_rows = tile_cap

    padded_total = rows_p * LANES

    def prep(x):
        x = jnp.asarray(x).reshape(-1)          # free reshape, keep dtype
        if padded_total != total:
            x = jnp.pad(x, (0, padded_total - total))
        return x.reshape(rows_p, LANES)

    p2, t2, g2 = prep(pred), prep(target), prep(grad)
    w2 = jnp.asarray(weight, jnp.float32).reshape(1, 1)

    nblk = pl.cdiv(rows_p, tile_rows)                # real row-blocks
    n_par = 2 if (num_cores >= 2 and nblk >= 2) else 1
    steps = pl.cdiv(nblk, n_par)                     # reduction steps / partial

    mask_last_block = (rows_p % tile_rows) != 0      # partial edge block?
    tail_rows = rows_p - (nblk - 1) * tile_rows      # valid rows in last block
    gate_blocks = (n_par * steps) != nblk            # clamped duplicates?

    kernel = functools.partial(
        _loss_kernel, steps=steps, tile_rows=tile_rows, nblk=nblk,
        tail_rows=tail_rows, mask_last_block=mask_last_block,
        gate_blocks=gate_blocks)

    def blk_map(pi, si):
        b = pi * steps + si
        return (jnp.minimum(b, nblk - 1), 0)   # clamp trailing (skipped) blocks

    in_block = pl.BlockSpec((tile_rows, LANES), blk_map)

    # Explicit VMEM limit: double-buffered input streams + generous headroom,
    # independent of the generation-specific scoped defaults.
    stream_bytes = 2 * tile_rows * LANES * in_itembytes
    vmem_limit = int(min(max(stream_bytes + (8 << 20), 16 << 20), 56 << 20))

    cost = pl.CostEstimate(flops=6 * total, transcendentals=0,
                           bytes_accessed=total * in_itembytes + 4 * n_par)

    def run(dim0_sem, dim1_sem):
        return pl.pallas_call(
            kernel,
            out_shape=jax.ShapeDtypeStruct((n_par, 1), jnp.float32),
            grid_spec=pltpu.PrefetchScalarGridSpec(
                num_scalar_prefetch=0,
                grid=(n_par, steps),
                in_specs=[
                    pl.BlockSpec(memory_space=pltpu.SMEM),   # weight scalar
                    in_block,                                # pred
                    in_block,                                # target
                    in_block,                                # grad
                ],
                out_specs=pl.BlockSpec((1, 1), lambda pi, si: (pi, 0)),
                scratch_shapes=[pltpu.VMEM((SUBLANES, LANES), jnp.float32)],
            ),
            compiler_params=pltpu.CompilerParams(
                dimension_semantics=(dim0_sem, dim1_sem),
                vmem_limit_bytes=vmem_limit,
            ),
            cost_estimate=cost,
        )(w2, p2, t2, g2)

    if n_par > 1:
        # v7x: shard the partial axis across the 2 TensorCores.
        try:
            partials = run(pltpu.CORE_PARALLEL, pltpu.ARBITRARY)
        except Exception:
            # Conservative fallback (previously validated configuration).
            partials = run("parallel", "arbitrary")
    else:
        partials = run("arbitrary", "arbitrary")

    # Combine per-core partials and apply 0.25 * mean scaling once.
    return (0.25 / total) * jnp.sum(partials)


def custom_loss_ref(pred, target, grad, weight=1.0):
    loss = (jnp.asarray(target, jnp.float32)
            + weight * jnp.asarray(pred, jnp.float32)
            * jnp.abs(jnp.asarray(grad, jnp.float32))) ** 2
    return 0.25 * loss.mean()


if __name__ == "__main__":
    key = jax.random.PRNGKey(0)
    k1, k2, k3 = jax.random.split(key, 3)

    # Small shape consistent with the forward: pred/target/grad all same shape.
    shape = (2, 4, 16, 16)
    pred = jax.random.normal(k1, shape, dtype=jnp.float32)
    target = jax.random.normal(k2, shape, dtype=jnp.float32)
    grad_in = jax.random.normal(k3, shape, dtype=jnp.float32)
    out = jax.block_until_ready(custom_loss(pred, target, grad_in, 1.0))
    ref = custom_loss_ref(pred, target, grad_in, 1.0)
    assert jnp.allclose(out, ref, rtol=1e-5, atol=1e-6), (out, ref)

    # Ragged small size: exercises the zero-pad single-block path.
    shape2 = (2, 3, 7, 5)
    p2 = jax.random.normal(k1, shape2, dtype=jnp.float32)
    t2 = jax.random.normal(k2, shape2, dtype=jnp.float32)
    g2 = jax.random.normal(k3, shape2, dtype=jnp.float32)
    out2 = jax.block_until_ready(custom_loss(p2, t2, g2, 0.5))
    ref2 = custom_loss_ref(p2, t2, g2, 0.5)
    assert jnp.allclose(out2, ref2, rtol=1e-5, atol=1e-6), (out2, ref2)

    # Medium size: exercises the multi-block streaming path with a partial
    # (gated + row-masked) edge block on all chip generations.
    shape3 = (3, 1153, 347)
    p3 = jax.random.normal(k1, shape3, dtype=jnp.float32)
    t3 = jax.random.normal(k2, shape3, dtype=jnp.float32)
    g3 = jax.random.normal(k3, shape3, dtype=jnp.float32)
    out3 = jax.block_until_ready(custom_loss(p3, t3, g3, 1.25))
    ref3 = custom_loss_ref(p3, t3, g3, 1.25)
    assert jnp.allclose(out3, ref3, rtol=1e-4, atol=1e-5), (out3, ref3)

    print("KERNEL_OK")
</pallas_src>

<mosaic_0001>
module attributes {stable_mosaic.version = 11 : i64} {
  func.func @_loss_kernel(%arg0: i32, %arg1: i32, %arg2: memref<1x1xf32, #tpu.memory_space<smem>>, %arg3: memref<16x128xf32, #tpu.memory_space<vmem>>, %arg4: memref<16x128xf32, #tpu.memory_space<vmem>>, %arg5: memref<16x128xf32, #tpu.memory_space<vmem>>, %arg6: memref<1x1xf32, #tpu.memory_space<vmem>>, %arg7: memref<8x128xf32, #tpu.memory_space<vmem>>) attributes {dimension_semantics = [#tpu.dimension_semantics<arbitrary>, #tpu.dimension_semantics<arbitrary>], iteration_bounds = array<i64: 1, 1>, scalar_prefetch = 0 : i64, scratch_operands = 1 : i64, tpu.core_type = #tpu.core_type<tc>, window_params = [{transform_indices = @transform_0, window_bounds = array<i64: 1, 1>}, {transform_indices = @transform_1, window_bounds = array<i64: 16, 128>}, {transform_indices = @transform_2, window_bounds = array<i64: 16, 128>}, {transform_indices = @transform_3, window_bounds = array<i64: 16, 128>}, {transform_indices = @transform_4, window_bounds = array<i64: 1, 1>}]} {
    %c0_i32 = arith.constant 0 : i32
    %0 = arith.cmpi eq, %arg1, %c0_i32 : i32
    %1 = arith.extui %0 : i1 to i32
    %c0_i32_0 = arith.constant 0 : i32
    %2 = arith.cmpi ne, %1, %c0_i32_0 : i32
    scf.if %2 {
      %cst_14 = arith.constant 0.000000e+00 : f32
      %21 = vector.broadcast %cst_14 : f32 to vector<8x128xf32>
      %c0_15 = arith.constant 0 : index
      %c0_16 = arith.constant 0 : index
      %22 = vector.load %arg7[%c0_15, %c0_16] : memref<8x128xf32, #tpu.memory_space<vmem>>, vector<8x128xf32>
      tpu.vector_store %arg7[%c0_15, %c0_16], %21 {strides = array<i32>} : memref<8x128xf32, #tpu.memory_space<vmem>>, vector<8x128xf32>,
    } else {
    }
    %c0 = arith.constant 0 : index
    %c0_1 = arith.constant 0 : index
    %3 = memref.load %arg2[%c0, %c0_1] : memref<1x1xf32, #tpu.memory_space<smem>>
    %c0_2 = arith.constant 0 : index
    %c0_3 = arith.constant 0 : index
    %4 = vector.load %arg3[%c0_2, %c0_3] : memref<16x128xf32, #tpu.memory_space<vmem>>, vector<16x128xf32>
    %c0_4 = arith.constant 0 : index
    %c0_5 = arith.constant 0 : index
    %5 = vector.load %arg4[%c0_4, %c0_5] : memref<16x128xf32, #tpu.memory_space<vmem>>, vector<16x128xf32>
    %c0_6 = arith.constant 0 : index
    %c0_7 = arith.constant 0 : index
    %6 = vector.load %arg5[%c0_6, %c0_7] : memref<16x128xf32, #tpu.memory_space<vmem>>, vector<16x128xf32>
    %7 = vector.broadcast %3 : f32 to vector<16x128xf32>
    %8 = arith.mulf %7, %4 : vector<16x128xf32>
    %9 = math.absf %6 : vector<16x128xf32>
    %10 = arith.mulf %8, %9 : vector<16x128xf32>
    %11 = arith.addf %5, %10 : vector<16x128xf32>
    %12 = arith.mulf %11, %11 : vector<16x128xf32>
    %c0_8 = arith.constant 0 : index
    %c0_9 = arith.constant 0 : index
    %13 = vector.load %arg7[%c0_8, %c0_9] : memref<8x128xf32, #tpu.memory_space<vmem>>, vector<8x128xf32>
    %14 = vector.shape_cast %12 : vector<16x128xf32> to vector<2x8x128xf32>
    %cst = arith.constant dense<0.000000e+00> : vector<8x128xf32>
    %15 = vector.multi_reduction <add>, %14, %cst [0] : vector<2x8x128xf32> to vector<8x128xf32>
    %16 = arith.addf %13, %15 : vector<8x128xf32>
    %c0_10 = arith.constant 0 : index
    %c0_11 = arith.constant 0 : index
    %17 = vector.load %arg7[%c0_10, %c0_11] : memref<8x128xf32, #tpu.memory_space<vmem>>, vector<8x128xf32>
    tpu.vector_store %arg7[%c0_10, %c0_11], %16 {strides = array<i32>} : memref<8x128xf32, #tpu.memory_space<vmem>>, vector<8x128xf32>,
    %c0_i32_12 = arith.constant 0 : i32
    %18 = arith.cmpi eq, %arg1, %c0_i32_12 : i32
    %19 = arith.extui %18 : i1 to i32
    %c0_i32_13 = arith.constant 0 : i32
    %20 = arith.cmpi ne, %19, %c0_i32_13 : i32
    scf.if %20 {
      %c0_14 = arith.constant 0 : index
      %c0_15 = arith.constant 0 : index
      %21 = vector.load %arg7[%c0_14, %c0_15] : memref<8x128xf32, #tpu.memory_space<vmem>>, vector<8x128xf32>
      %22 = vector.shape_cast %21 : vector<8x128xf32> to vector<1x8x128xf32>
      %cst_16 = arith.constant dense<0.000000e+00> : vector<1xf32>
      %23 = vector.multi_reduction <add>, %22, %cst_16 [1, 2] : vector<1x8x128xf32> to vector<1xf32>
      %24 = vector.shape_cast %23 : vector<1xf32> to vector<1x1x1xf32>
      %25 = vector.extract %24[0, 0, 0] : f32 from vector<1x1x1xf32>
      %26 = vector.broadcast %25 : f32 to vector<1x1xf32>
      %c0_17 = arith.constant 0 : index
      %c0_18 = arith.constant 0 : index
      %27 = vector.load %arg6[%c0_17, %c0_18] : memref<1x1xf32, #tpu.memory_space<vmem>>, vector<1x1xf32>
      tpu.vector_store %arg6[%c0_17, %c0_18], %26 {strides = array<i32>} : memref<1x1xf32, #tpu.memory_space<vmem>>, vector<1x1xf32>,
    } else {
    }
    return
  }
  func.func @transform_0(%arg0: i32, %arg1: i32) -> (i32, i32) {
    %c0_i32 = arith.constant 0 : i32
    %c0_i32_0 = arith.constant 0 : i32
    %c0_i32_1 = arith.constant 0 : i32
    return %c0_i32, %c0_i32_0 : i32, i32
  }
  func.func @transform_1(%arg0: i32, %arg1: i32) -> (i32, i32) {
    %c1_i32 = arith.constant 1 : i32
    %0 = arith.muli %arg0, %c1_i32 : i32
    %1 = arith.addi %0, %arg1 : i32
    %c0_i32 = arith.constant 0 : i32
    %2 = arith.minsi %1, %c0_i32 : i32
    %c0_i32_0 = arith.constant 0 : i32
    %c0_i32_1 = arith.constant 0 : i32
    return %2, %c0_i32_0 : i32, i32
  }
  func.func @transform_2(%arg0: i32, %arg1: i32) -> (i32, i32) {
    %c1_i32 = arith.constant 1 : i32
    %0 = arith.muli %arg0, %c1_i32 : i32
    %1 = arith.addi %0, %arg1 : i32
    %c0_i32 = arith.constant 0 : i32
    %2 = arith.minsi %1, %c0_i32 : i32
    %c0_i32_0 = arith.constant 0 : i32
    %c0_i32_1 = arith.constant 0 : i32
    return %2, %c0_i32_0 : i32, i32
  }
  func.func @transform_3(%arg0: i32, %arg1: i32) -> (i32, i32) {
    %c1_i32 = arith.constant 1 : i32
    %0 = arith.muli %arg0, %c1_i32 : i32
    %1 = arith.addi %0, %arg1 : i32
    %c0_i32 = arith.constant 0 : i32
    %2 = arith.minsi %1, %c0_i32 : i32
    %c0_i32_0 = arith.constant 0 : i32
    %c0_i32_1 = arith.constant 0 : i32
    return %2, %c0_i32_0 : i32, i32
  }
  func.func @transform_4(%arg0: i32, %arg1: i32) -> (i32, i32) {
    %c0_i32 = arith.constant 0 : i32
    %c0_i32_0 = arith.constant 0 : i32
    return %arg0, %c0_i32 : i32, i32
  }
}

</mosaic_0001>

<bundles_post_ra>
// kernel: tpu_custom_call.1
= control target key start
LH: loop header
LB: loop body
LE: loop exit
PB: predicated region body
PF: predicated region fallthrough
CT: control target
= control target key end

     0   :  { %10 = vsyncpa [#allocation5], 0  ;;  %s355_s0 = inlined_call_operand.<no memory space> [shape: f32[1,1], index: 0, kind: input, shape index: {}]   ;;  %s356_s1 = inlined_call_operand.hbm [shape: f32[16,128], index: 1, kind: input, shape index: {}]   ;;  %s357_s2 = inlined_call_operand.hbm [shape: f32[16,128], index: 2, kind: input, shape index: {}]   ;;  %s358_s3 = inlined_call_operand.hbm [shape: f32[16,128], index: 3, kind: input, shape index: {}]   ;;  %s359_s4 = inlined_call_operand.hbm [shape: f32[1,1], index: 4, kind: output, shape index: {}]  }
   0x1   :  { %11 = vsyncpa [#allocation8], 0 }
   0x2   :  { %12 = vsyncpa [#allocation6], 0  ;;  %s257_s15 = smov [#allocation7]   ;;  %s258_s17 = smov [#allocation4]  }
   0x3   :  { %s44_s16 = sshll.u32 %s257_s15, 4  ;;  %s26_s18 = sshll.u32 %s258_s17, 4  ;;  %s45_s16 = int_to_ptr.vmem [resolvable:$true] %s44_s16  ;;  %s288_s18 = int_to_ptr.vmem [resolvable:$true] %s26_s18 }
   0x4   :  { %s163_s21 = scalar_lea.hbm %s357_s2, 256 }
   0x5   :  { %p164_p0 = scmp.ne.s32.totalorder %s357_s2, %s163_s21  ;;  %p167_p1 = scmp.lt.u32.totalorder %s163_s21, %s357_s2 }
   0x7   :  { %p169_p2 = pnand %p167_p1, %p164_p0 }
   0x9   :  { %172 = shalt.err (!%p169_p2)
}
   0xa   :  { %s173_s26 = scalar_lea.vmem %s45_s16, 256  ;;  %p178_p4 = scmp.lt.s32.totalorder %s45_s16, %s45_s16 }
   0xb   :  { %p174_p3 = scmp.ne.s32.totalorder %s45_s16, %s173_s26  ;;  %p179_p5 = scmp.lt.s32.totalorder %s173_s26, %s173_s26 }
   0xd   :  { %p180_p6 = por %p179_p5, %p178_p4 }
   0xf   :  { %p181_p7 = pnand %p180_p6, %p174_p3 }
  0x11   :  { %184 = shalt.err (!%p181_p7)
}
  0x12   :  { %s259_s27 = smov 128   ;;  %s260_s28 = smov 8  }
  0x13   :  { %50 = dma.hbm_to_vmem [thread:$0]  %s357_s2, 256, %s45_s16, [#allocation8], %s259_s27, %s259_s27, %s260_s28  }
  0x14   :  { %s185_s7 = scalar_lea.hbm %s356_s1, 256 }
  0x15   :  { %p186_p8 = scmp.ne.s32.totalorder %s356_s1, %s185_s7  ;;  %p189_p9 = scmp.lt.u32.totalorder %s185_s7, %s356_s1 }
  0x17   :  { %p191_p10 = pnand %p189_p9, %p186_p8 }
  0x19   :  { %194 = shalt.err (!%p191_p10)
}
  0x1a   :  { %s195_s12 = scalar_lea.vmem %s288_s18, 256  ;;  %p200_p12 = scmp.lt.s32.totalorder %s288_s18, %s288_s18 }
  0x1b   :  { %p196_p11 = scmp.ne.s32.totalorder %s288_s18, %s195_s12  ;;  %p201_p13 = scmp.lt.s32.totalorder %s195_s12, %s195_s12 }
  0x1d   :  { %p202_p0 = por %p201_p13, %p200_p12 }
  0x1f   :  { %p203_p1 = pnand %p202_p0, %p196_p11 }
  0x21   :  { %206 = shalt.err (!%p203_p1)
}
  0x22   :  { %32 = dma.hbm_to_vmem [thread:$0]  %s356_s1, 256, %s288_s18, [#allocation5], %s259_s27, %s259_s27, %s260_s28  }
  0x23   :  { %s261_s14 = smov [#allocation9]   ;;  %s207_s19 = scalar_lea.hbm %s358_s3, 256 }
  0x24   :  { %s62_s15 = sshll.u32 %s261_s14, 4  ;;  %p208_p2 = scmp.ne.s32.totalorder %s358_s3, %s207_s19  ;;  %s63_s15 = int_to_ptr.vmem [resolvable:$true] %s62_s15 }
  0x25   :  { %p211_p3 = scmp.lt.u32.totalorder %s207_s19, %s358_s3 }
  0x27   :  { %p213_p4 = pnand %p211_p3, %p208_p2 }
  0x29   :  { %216 = shalt.err (!%p213_p4)
}
  0x2a   :  { %s217_s24 = scalar_lea.vmem %s63_s15, 256  ;;  %p222_p6 = scmp.lt.s32.totalorder %s63_s15, %s63_s15 }
  0x2b   :  { %p218_p5 = scmp.ne.s32.totalorder %s63_s15, %s217_s24  ;;  %p223_p7 = scmp.lt.s32.totalorder %s217_s24, %s217_s24 }
  0x2d   :  { %p224_p8 = por %p223_p7, %p222_p6 }
  0x2f   :  { %p225_p9 = pnand %p224_p8, %p218_p5 }
  0x31   :  { %228 = shalt.err (!%p225_p9)
}
  0x32   :  { %68 = dma.hbm_to_vmem [thread:$0]  %s358_s3, 256, %s63_s15, [#allocation8], %s259_s27, %s259_s27, %s260_s28  }
  0x33   :  { %251 = dma.done.wait [#allocation5], 256  }
  0x34   :  { %252 = vsyncadd [#allocation5], 4294967040 }
  0x35   :  { %253 = dma.done.wait [#allocation8], 512  }
  0x36   :  { %254 = vsyncadd [#allocation8], 4294966784  ;;  %v102_v0 = vstv %s355_s0  ;;  %v96_v1 = vld [vmem:[#allocation4] sm:$0xff]  ;;  %v97_v2 = vld [vmem:[#allocation4 + $0x8] sm:$0xff]  ;;  %s262_s0 = smov [#allocation10]   ;;  %vm131_vm0 = vcmask 0  }
  0x37   :  { %v100_v3 = vld [vmem:[#allocation9] sm:$0xff]  ;;  %v101_v4 = vld [vmem:[#allocation9 + $0x8] sm:$0xff]  ;;  %v103_v5 = vmul.f32 %v102_v0, %v96_v1  ;;  %v104_v6 = vmul.f32 %v102_v0, %v97_v2  ;;  %v98_v9 = vld [vmem:[#allocation7] sm:$0xff]  ;;  %s139_s3 = sshll.u32 %s262_s0, 4  ;;  %s140_s3 = int_to_ptr.vmem [resolvable:$true] %s139_s3 }
  0x38   :  { %v105_v7 = vand.u32 2147483647, %v100_v3  ;;  %v106_v8 = vand.u32 2147483647, %v101_v4  ;;  %v99_v10 = vld [vmem:[#allocation7 + $0x8] sm:$0xff]  ;;  %s229_s28 = scalar_lea.vmem %s140_s3, 16  ;;  %p234_p11 = scmp.lt.s32.totalorder %s140_s3, %s140_s3 }
  0x39   :  { %p230_p10 = scmp.ne.s32.totalorder %s140_s3, %s229_s28  ;;  %s233_s29 = scalar_lea.vmem %s140_s3, 32 }
  0x3a   :  { %v107_v11 = vmul.f32 %v105_v7, %v103_v5  ;;  %v108_v12 = vmul.f32 %v106_v8, %v104_v6  ;;  %p235_p12 = scmp.lt.s32.totalorder %s233_s29, %s229_s28 }
  0x3c   :  { %v109_v13 = vadd.f32 %v107_v11, %v98_v9  ;;  %v110_v14 = vadd.f32 %v108_v12, %v99_v10  ;;  %p236_p13 = por %p235_p12, %p234_p11 }
  0x3e   :  { %v111_v15 = vmul.f32 %v109_v13, %v109_v13  ;;  %v112_v16 = vmul.f32 %v110_v14, %v110_v14  ;;  %p237_p0 = pnand %p236_p13, %p230_p10 }
  0x40   :  { %v114_v17 = vadd.f32 %v112_v16, %v111_v15 }
  0x42   :  { %121 = vadd.xlane.f32.xlu0 %v114_v17 }
  0xcf   :  { %v122_v18 = vpop.xlane.xlu0 %121 }
  0xd0   :  { %v123_v19 = vrot.slane %v122_v18, 4 }
  0xd2   :  { %v124_v20 = vadd.f32 %v123_v19, %v122_v18 }
  0xd4   :  { %v125_v21 = vrot.slane %v124_v20, 2 }
  0xd6   :  { %v126_v22 = vadd.f32 %v125_v21, %v124_v20 }
  0xd8   :  { %v127_v23 = vrot.slane %v126_v22, 1 }
  0xda   :  { %v128_v24 = vadd.f32 %v127_v23, %v126_v22 }
  0xdc   :  { %155 = vpush %v128_v24 }
 0x10d   :  { %s156_s27 = spop %155 }
 0x10e   :  { %v130_v25 = vstv %s156_s27 }
 0x10f   :  { %132 = vst.msk [vmem:[#allocation10] sm:$0x1] %vm131_vm0, %v130_v25 }
 0x110   :  { %240 = shalt.err (!%p237_p0)
}
 0x111   :  { %s241_s6 = scalar_lea.hbm %s359_s4, 16 }
 0x112   :  { %p242_p1 = scmp.ne.s32.totalorder %s359_s4, %s241_s6  ;;  %p245_p2 = scmp.lt.u32.totalorder %s241_s6, %s359_s4 }
 0x114   :  { %p247_p3 = pnand %p245_p2, %p242_p1 }
 0x116   :  { %250 = shalt.err (!%p247_p3)
}
 0x117   :  { %142 = dma.vmem_to_hbm [thread:$0]  %s140_s3, 16, %s359_s4, [#allocation6]  }
 0x118   :  { %255 = dma.done.wait [#allocation6], 16  }
 0x119   :  { %256 = vsyncadd [#allocation6], 4294967280 }
 0x11a   :  { %146 = vsyncpa [#allocation5], 1 }
 0x11b   :  { %147 = vsyncpa [#allocation8], 1 }
 0x11c   :  { %148 = vsyncpa [#allocation6], 1 }

</bundles_post_ra>
